<compile_context>
chip_gen: v7x
topology: tpu7x:2x2x1
jax: 0.10.0
libtpu: 0.0.40
codegen_flags: <defaults>
</compile_context>

<pallas_src>
import math

import numpy as np
import jax
import jax.numpy as jnp
from jax.experimental import pallas as pl
from jax.experimental.pallas import tpu as pltpu


def _round_up(x: int, m: int) -> int:
    return ((x + m - 1) // m) * m


def _pe_kernel(pos_ref, fp_ref, out_ref):
    # pos_ref: (TP, 1)  f32 — positions for this row tile
    # fp_ref : (2, TN)  f32 — row 0: inv_freq (pos-independent), row 1: phase (0 or pi/2)
    # out_ref: (TP, TN) out_dtype
    pos = pos_ref[...]                 # (TP, 1)
    inv_freq = fp_ref[0:1, :]          # (1, TN)
    phase = fp_ref[1:2, :]             # (1, TN)
    # angle = pos * 10000**(-2*even_base/d_model); sin(angle + pi/2) == cos(angle)
    angle = pos * inv_freq + phase     # single VPU mul-add per element
    out_ref[...] = jnp.sin(angle).astype(out_ref.dtype)   # single EUP op, cast at store


def _choose_tiles(P: int, dim: int, itemsize: int):
    """Pick (row_tile, dim_tile) for the grid."""
    dim_vmem = max(128, _round_up(dim, 128))   # lanes actually resident per row in VMEM
    vmem_budget = 10 << 20                     # double-buffered output budget; fits v5e's
                                               # 16 MiB default scoped VMEM (v6e/v7x larger)
    target_tile = 2 << 20                      # ~2 MiB writeback/step amortizes ~0.35us step overhead

    if 2 * 16 * dim_vmem * itemsize <= vmem_budget:
        tn = dim                               # no dim tiling: block last dim == full dim (always legal)
        tn_vmem = dim_vmem
    else:
        tn = 2048                              # huge dim: tile lanes (multiple of 128 -> legal, ragged tail ok)
        tn_vmem = 2048

    tp = target_tile // (tn_vmem * itemsize)
    tp = min(tp, vmem_budget // (2 * tn_vmem * itemsize))      # VMEM cap (double-buffered)
    tp = min(tp, _round_up(max(pl.cdiv(P, 2), 1), 16))         # >= 2 row steps when possible (v7x: 2 TCs)
    tp = max(16, (tp // 16) * 16)                              # multiple of 16 sublanes (bf16-safe)
    return tp, tn


def positional_embedding_batch(positions, dim: int, d_model: int, *,
                               out_dtype=jnp.float32) -> jax.Array:
    """Positional embeddings for a vector of positions. Returns (P, dim)."""
    assert dim % 2 == 0, "dim must be even"
    positions = jnp.asarray(positions, dtype=jnp.float32).reshape(-1, 1)   # (P, 1), no padding
    P = positions.shape[0]
    itemsize = jnp.dtype(out_dtype).itemsize

    tp, tn = _choose_tiles(P, dim, itemsize)
    grid = (pl.cdiv(P, tp), pl.cdiv(dim, tn))

    # Host-precomputed, pos-independent frequency / phase table (2, dim).
    idx = np.arange(dim)
    even_base = idx & ~1                                     # even i -> i, odd i -> i-1
    inv_freq = np.exp(-math.log(10000.0) * 2.0 * even_base / float(d_model))
    phase = (idx & 1) * (math.pi / 2.0)                      # 0 for even, pi/2 for odd
    fp = jnp.asarray(np.stack([inv_freq, phase]), dtype=jnp.float32)       # (2, dim)

    cost = pl.CostEstimate(
        flops=2 * P * dim,
        transcendentals=P * dim,
        bytes_accessed=P * dim * itemsize + P * 4 + 2 * dim * 4,
    )

    return pl.pallas_call(
        _pe_kernel,
        out_shape=jax.ShapeDtypeStruct((P, dim), out_dtype),
        grid=grid,
        in_specs=[
            pl.BlockSpec((tp, 1), lambda r, c: (r, 0)),      # positions column tile
            pl.BlockSpec((2, tn), lambda r, c: (0, c)),      # shared freq/phase table (dim tile)
        ],
        out_specs=pl.BlockSpec((tp, tn), lambda r, c: (r, c)),
        compiler_params=pltpu.CompilerParams(
            dimension_semantics=("parallel", "parallel")),   # row axis shards across v7x's 2 TCs
        cost_estimate=cost,
    )(positions, fp)


def positional_embedding(pos: float, dim: int, d_model: int) -> jax.Array:
    """Module-equivalent API: (1, dim) embedding row for a single scalar pos."""
    # NOTE: for a truly single row per call, fusing this into the consumer in
    # plain jnp is cheaper than any kernel launch; the batched path is the fast one.
    return positional_embedding_batch(jnp.asarray([pos], jnp.float32), dim, d_model)


def _reference_row(pos: float, dim: int, d_model: int) -> np.ndarray:
    """Pure-Python reference mirroring the intended PyTorch loop."""
    pe = [0.0] * dim
    for i in range(0, dim, 2):
        pe[i] = math.sin(pos / 10000 ** (2 * i / d_model))
        pe[i + 1] = math.cos(pos / 10000 ** (2 * i / d_model))
    return np.asarray(pe, dtype=np.float32)


if __name__ == "__main__":
    key = jax.random.PRNGKey(0)

    # --- small batch matching the module's scale ---
    dim, d_model = 32, 32
    positions = jax.random.randint(key, (8,), 0, 64).astype(jnp.float32)
    out = jax.block_until_ready(positional_embedding_batch(positions, dim, d_model))
    ref = np.stack([_reference_row(float(p), dim, d_model)
                    for p in np.asarray(positions).ravel()])
    assert out.shape == (8, dim), out.shape
    assert out.dtype == jnp.float32, out.dtype
    assert np.allclose(np.asarray(out), ref, atol=1e-4, rtol=1e-4)

    # --- ragged case: P not a multiple of the row tile, dim not a multiple of 128 ---
    dim2, d_model2 = 96, 64
    pos2 = jax.random.randint(jax.random.PRNGKey(1), (37,), 0, 128).astype(jnp.float32)
    out2 = jax.block_until_ready(positional_embedding_batch(pos2, dim2, d_model2))
    ref2 = np.stack([_reference_row(float(p), dim2, d_model2)
                     for p in np.asarray(pos2).ravel()])
    assert out2.shape == (37, dim2), out2.shape
    assert np.allclose(np.asarray(out2), ref2, atol=1e-4, rtol=1e-4)

    # --- module-equivalent single-position path ---
    pos0 = float(np.asarray(positions)[0])
    row = jax.block_until_ready(positional_embedding(pos0, dim, d_model))
    assert row.shape == (1, dim)
    assert np.allclose(np.asarray(row), ref[0:1], atol=1e-4, rtol=1e-4)

    print("KERNEL_OK")
</pallas_src>

<mosaic_0001>
module attributes {stable_mosaic.version = 11 : i64} {
  func.func @_pe_kernel(%arg0: i32, %arg1: i32, %arg2: memref<16x1xf32, #tpu.memory_space<vmem>>, %arg3: memref<2x32xf32, #tpu.memory_space<vmem>>, %arg4: memref<16x32xf32, #tpu.memory_space<vmem>>) attributes {dimension_semantics = [#tpu.dimension_semantics<parallel>, #tpu.dimension_semantics<parallel>], iteration_bounds = array<i64: 1, 1>, scalar_prefetch = 0 : i64, scratch_operands = 0 : i64, tpu.core_type = #tpu.core_type<tc>, window_params = [{transform_indices = @transform_0, window_bounds = array<i64: 16, 1>}, {transform_indices = @transform_1, window_bounds = array<i64: 2, 32>}, {transform_indices = @transform_2, window_bounds = array<i64: 16, 32>}]} {
    %c0 = arith.constant 0 : index
    %c0_0 = arith.constant 0 : index
    %0 = vector.load %arg2[%c0, %c0_0] : memref<16x1xf32, #tpu.memory_space<vmem>>, vector<16x1xf32>
    %c0_1 = arith.constant 0 : index
    %c0_2 = arith.constant 0 : index
    %1 = vector.load %arg3[%c0_1, %c0_2] : memref<2x32xf32, #tpu.memory_space<vmem>>, vector<1x32xf32>
    %c1 = arith.constant 1 : index
    %c0_3 = arith.constant 0 : index
    %2 = vector.load %arg3[%c1, %c0_3] : memref<2x32xf32, #tpu.memory_space<vmem>>, vector<1x32xf32>
    %3 = vector.broadcast %0 : vector<16x1xf32> to vector<16x32xf32>
    %4 = vector.broadcast %1 : vector<1x32xf32> to vector<16x32xf32>
    %5 = arith.mulf %3, %4 : vector<16x32xf32>
    %6 = vector.broadcast %2 : vector<1x32xf32> to vector<16x32xf32>
    %7 = arith.addf %5, %6 : vector<16x32xf32>
    %8 = math.sin %7 : vector<16x32xf32>
    %c0_4 = arith.constant 0 : index
    %c0_5 = arith.constant 0 : index
    %9 = vector.load %arg4[%c0_4, %c0_5] : memref<16x32xf32, #tpu.memory_space<vmem>>, vector<16x32xf32>
    tpu.vector_store %arg4[%c0_4, %c0_5], %8 {strides = array<i32>} : memref<16x32xf32, #tpu.memory_space<vmem>>, vector<16x32xf32>,
    return
  }
  func.func @transform_0(%arg0: i32, %arg1: i32) -> (i32, i32) {
    %c0_i32 = arith.constant 0 : i32
    %c0_i32_0 = arith.constant 0 : i32
    return %arg0, %c0_i32 : i32, i32
  }
  func.func @transform_1(%arg0: i32, %arg1: i32) -> (i32, i32) {
    %c0_i32 = arith.constant 0 : i32
    %c0_i32_0 = arith.constant 0 : i32
    return %c0_i32, %arg1 : i32, i32
  }
  func.func @transform_2(%arg0: i32, %arg1: i32) -> (i32, i32) {
    %c0_i32 = arith.constant 0 : i32
    return %arg0, %arg1 : i32, i32
  }
}

</mosaic_0001>

<bundles_post_ra>
// kernel: tpu_custom_call.1
= control target key start
LH: loop header
LB: loop body
LE: loop exit
PB: predicated region body
PF: predicated region fallthrough
CT: control target
= control target key end

     0   :  { %v326_v1 = vmov 0   ;;  %s445_s0 = inlined_call_operand.vmem [shape: f32[8,1], index: 0, kind: input, shape index: {}]   ;;  %s446_s1 = inlined_call_operand.vmem [shape: f32[2,32], index: 1, kind: input, shape index: {}]   ;;  %s447_s2 = inlined_call_operand.hbm [shape: f32[8,32], index: 2, kind: output, shape index: {}]  }
   0x1   :  { %v12_v0 = vld [vmem:[%s445_s0] sm:$0xff]  ;;  %293 = vset.pattern.permute.xlu0 %v326_v1  ;;  %v13_v2 = vld [vmem:[%s445_s0 + $0x8] sm:$0xff] }
   0x2   :  { %18 = vperm.xlu0 %293, %v12_v0  }
   0x3   :  { %7 = vsyncpa [#allocation3], 0  ;;  %v265_v3 = vld [vmem:[%s446_s1] ss:$0 sm:$0xff]  ;;  %v266_v4 = vld [vmem:[%s446_s1 + $0x1] ss:$0 sm:$0xff] }
   0x4   :  { %v327_v27 = vmov 683565275   ;;  %v328_v31 = vmov 2475754826   ;;  %v329_v33 = vmov 2131351028  }
   0x5   :  { %v330_v35 = vmov 2102212464   ;;  %v331_v37 = vmov 920167782   ;;  %v332_v44 = vmov 1326507024  }
   0x6   :  { %23 = vperm.xlu0 %293, %v13_v2  }
  0x81   :  { %v19_v5 = vpop.permute.xlu0 %18 }
  0x82   :  { %v30_v6 = vmul.f32 %v265_v3, %v19_v5 }
  0x84   :  { %v363_v7 = vadd.f32 %v266_v4, %v30_v6 }
  0x85   :  { %v24_v8 = vpop.permute.xlu0 %23 }
  0x86   :  { %v38_v9 = vand.u32 2147483647, %v363_v7  ;;  %v41_v10 = vand.u32 2139095040, %v363_v7  ;;  %v31_v11 = vmul.f32 %v265_v3, %v24_v8  ;;  %vm40_vm14 = vcmp.lt.s32.totalorder %v363_v7, 0 }
  0x88   :  { %v42_v12 = vshrl.u32 %v41_v10, 23  ;;  %v45_v13 = vand.u32 8388607, %v38_v9  ;;  %v369_v14 = vadd.f32 %v266_v4, %v31_v11  ;;  %vm39_vm15 = vcmp.le.f32.partialorder %v38_v9, 0.7853982 }
  0x8a   :  { %v267_v15 = vadd.s32 4294967169, %v42_v12  ;;  %v145_v16 = vand.u32 2139095040, %v369_v14  ;;  %v46_v18 = vor.u32 8388608, %v45_v13  ;;  %v142_v20 = vand.u32 2147483647, %v369_v14 }
  0x8c   :  { %v48_v17 = vadd.s32 1, %v267_v15  ;;  %v146_v19 = vshrl.u32 %v145_v16, 23  ;;  %v373_v25 = vshll.u32 %v46_v18, 8  ;;  %v149_v29 = vand.u32 8388607, %v142_v20 }
  0x8e   :  { %vm49_vm0 = vcmp.gt.s32.totalorder %v48_v17, 0  ;;  %v271_v22 = vadd.s32 4294967169, %v146_v19  ;;  %v150_v59 = vor.u32 8388608, %v149_v29 }
  0x8f   :  { %v50_v21 = vsel %vm49_vm0, %v48_v17, 0  ;;  %vm144_vm0 = vcmp.lt.s32.totalorder %v369_v14, 0 }
  0x90   :  { %v51_v23 = vshrl.u32 %v50_v21, 5  ;;  %v52_v24 = vand.u32 31, %v50_v21  ;;  %v152_v30 = vadd.s32 1, %v271_v22  ;;  %v190_v10 = vshll.u32 %v150_v59, 8 }
  0x92   :  { %v53_v26 = vsub.s32 32, %v52_v24  ;;  %v55_v28 = vshll.u32 %v327_v27, %v52_v24  ;;  %v58_v32 = vshll.u32 %v328_v31, %v52_v24  ;;  %v61_v34 = vshll.u32 %v329_v33, %v52_v24 }
  0x93   :  { %v64_v36 = vshll.u32 %v330_v35, %v52_v24  ;;  %v67_v38 = vshll.u32 %v331_v37, %v52_v24  ;;  %vm70_vm1 = vcmp.lt.s32.totalorder %v51_v23, 1  ;;  %vm72_vm2 = vcmp.lt.s32.totalorder %v51_v23, 3 }
  0x94   :  { %v56_v39 = vshrl.u32 %v328_v31, %v53_v26  ;;  %v59_v40 = vshrl.u32 %v329_v33, %v53_v26  ;;  %v62_v41 = vshrl.u32 %v330_v35, %v53_v26  ;;  %v54_v42 = vshrl.u32 %v327_v27, %v53_v26 }
  0x95   :  { %v65_v43 = vshrl.u32 %v331_v37, %v53_v26  ;;  %v68_v45 = vshrl.u32 %v332_v44, %v53_v26  ;;  %vm153_vm3 = vcmp.gt.s32.totalorder %v152_v30, 0  ;;  %vm73_vm4 = vcmp.lt.s32.totalorder %v51_v23, 4 }
  0x96   :  { %v57_v46 = vor.u32 %v56_v39, %v55_v28  ;;  %v60_v47 = vor.u32 %v59_v40, %v58_v32  ;;  %v63_v48 = vor.u32 %v62_v41, %v61_v34  ;;  %v154_v51 = vsel %vm153_vm3, %v152_v30, 0 }
  0x97   :  { %v66_v49 = vor.u32 %v65_v43, %v64_v36  ;;  %v69_v50 = vor.u32 %v68_v45, %v67_v38  ;;  %vm71_vm5 = vcmp.lt.s32.totalorder %v51_v23, 2  ;;  %v156_v62 = vand.u32 31, %v154_v51 }
  0x98   :  { %v74_v52 = vsel %vm70_vm1, %v54_v42, %v57_v46  ;;  %v75_v53 = vsel %vm73_vm4, %v63_v48, 2102212464  ;;  %v78_v54 = vsel %vm70_vm1, %v57_v46, %v60_v47  ;;  %v82_v55 = vsel %vm70_vm1, %v60_v47, %v63_v48 }
  0x99   :  { %v76_v56 = vsel %vm72_vm2, %v60_v47, %v75_v53  ;;  %v79_v57 = vsel %vm73_vm4, %v66_v49, 920167782  ;;  %v83_v58 = vsel %vm73_vm4, %v69_v50, 1326507024  ;;  %v155_v6 = vshrl.u32 %v154_v51, 5 }
  0x9a   :  { %v80_v60 = vsel %vm72_vm2, %v63_v48, %v79_v57  ;;  %v84_v61 = vsel %vm72_vm2, %v66_v49, %v83_v58  ;;  %v77_v63 = vsel %vm71_vm5, %v74_v52, %v76_v56  ;;  %v157_v8 = vsub.s32 32, %v156_v62 }
  0x9b   :  { %v81_v0 = vsel %vm71_vm5, %v78_v54, %v80_v60  ;;  %v85_v1 = vsel %vm71_vm5, %v82_v55, %v84_v61  ;;  %v93_v11 = vmul.u32 %v373_v25, %v77_v63  ;;  %v159_v12 = vshll.u32 %v327_v27, %v156_v62 }
  0x9c   :  { %v386_v2 = vmul.u32.u64.low %v373_v25, %v85_v1  ;;  %v387_v3 = vmul.u32.u64.high %v373_v25, %v85_v1, %v386_v2  ;;  %v390_v4 = vmul.u32.u64.low %v373_v25, %v81_v0  ;;  %v391_v5 = vmul.u32.u64.high %v373_v25, %v81_v0, %v390_v4 }
  0x9d   :  { %v162_v13 = vshll.u32 %v328_v31, %v156_v62  ;;  %v165_v15 = vshll.u32 %v329_v33, %v156_v62  ;;  %v160_v16 = vshrl.u32 %v328_v31, %v157_v8  ;;  %v163_v17 = vshrl.u32 %v329_v33, %v157_v8 }
  0x9e   :  { %v166_v18 = vshrl.u32 %v330_v35, %v157_v8  ;;  %v168_v19 = vshll.u32 %v330_v35, %v156_v62  ;;  %vm95_vm6 = vc.u32 %v387_v3, %v390_v4  ;;  %v96_v21 = vadd.s32 1, %v391_v5 }
  0x9f   :  { %v169_v22 = vshrl.u32 %v331_v37, %v157_v8  ;;  %v171_v23 = vshll.u32 %v331_v37, %v156_v62  ;;  %v161_v24 = vor.u32 %v160_v16, %v159_v12  ;;  %v164_v26 = vor.u32 %v163_v17, %v162_v13 }
  0xa0   :  { %v167_v28 = vor.u32 %v166_v18, %v165_v15  ;;  %v172_v29 = vshrl.u32 %v332_v44, %v157_v8  ;;  %v97_v25 = vsel %vm95_vm6, %v96_v21, %v391_v5  ;;  %vm174_vm7 = vcmp.lt.s32.totalorder %v155_v6, 1 }
  0xa1   :  { %v170_v30 = vor.u32 %v169_v22, %v168_v19  ;;  %vm177_vm8 = vcmp.lt.s32.totalorder %v155_v6, 4  ;;  %v98_v31 = vadd.s32 %v97_v25, %v93_v11  ;;  %vm176_vm9 = vcmp.lt.s32.totalorder %v155_v6, 3 }
  0xa2   :  { %v173_v32 = vor.u32 %v172_v29, %v171_v23  ;;  %v179_v33 = vsel %vm177_vm8, %v167_v28, 2102212464  ;;  %v158_v34 = vshrl.u32 %v327_v27, %v157_v8  ;;  %v182_v35 = vsel %vm174_vm7, %v161_v24, %v164_v26 }
  0xa3   :  { %v183_v36 = vsel %vm177_vm8, %v170_v30, 920167782  ;;  %v186_v38 = vsel %vm174_vm7, %v164_v26, %v167_v28  ;;  %v99_v39 = vadd.s32 536870912, %v98_v31  ;;  %vm175_vm10 = vcmp.lt.s32.totalorder %v155_v6, 2 }
  0xa4   :  { %v184_v37 = vsel %vm176_vm9, %v167_v28, %v183_v36  ;;  %v187_v40 = vsel %vm177_vm8, %v173_v32, 1326507024  ;;  %v178_v41 = vsel %vm174_vm7, %v158_v34, %v161_v24  ;;  %v180_v42 = vsel %vm176_vm9, %v164_v26, %v179_v33 }
  0xa5   :  { %v185_v43 = vsel %vm175_vm10, %v182_v35, %v184_v37  ;;  %v188_v44 = vsel %vm176_vm9, %v170_v30, %v187_v40  ;;  %v100_v45 = vshrl.u32 %v99_v39, 30  ;;  %v181_v51 = vsel %vm175_vm10, %v178_v41, %v180_v42 }
  0xa6   :  { %v189_v46 = vsel %vm175_vm10, %v186_v38, %v188_v44  ;;  %v401_v47 = vmul.u32.u64.low %v190_v10, %v185_v43  ;;  %v402_v48 = vmul.u32.u64.high %v190_v10, %v185_v43, %v401_v47  ;;  %v197_v54 = vmul.u32 %v190_v10, %v181_v51 }
  0xa7   :  { %v404_v49 = vmul.u32.u64.low %v190_v10, %v189_v46  ;;  %v405_v50 = vmul.u32.u64.high %v190_v10, %v189_v46, %v404_v49  ;;  %v101_v27 = vshll.u32 %v100_v45, 30  ;;  %v94_v2 = vadd.s32 %v390_v4, %v387_v3 }
  0xa8   :  { %v200_v53 = vadd.s32 1, %v402_v48  ;;  %v124_v24 = vsub.s32 4, %v100_v45  ;;  %vm420_vm1 = vcmp.le.f32.partialorder %v142_v20, 0.7853982  ;;  %vm246_vm4 = vcmask 261120  }
  0xa9   :  { %v102_v52 = vsub.s32 %v98_v31, %v101_v27  ;;  %vm199_vm11 = vc.u32 %v405_v50, %v401_v47  ;;  %v198_v3 = vadd.s32 %v401_v47, %v405_v50  ;;  %vm130_vm6 = vweird.f32 %v363_v7 }
  0xaa   :  { %v201_v56 = vsel %vm199_vm11, %v200_v53, %v402_v48  ;;  %v125_v33 = vsel %vm40_vm14, %v124_v24, %v100_v45  ;;  %vm234_vm10 = vweird.f32 %v369_v14 }
  0xab   :  { %v104_v55 = vsub.s32 0, %v102_v52  ;;  %v202_v57 = vadd.s32 %v201_v56, %v197_v54  ;;  %v127_v38 = vsel %vm39_vm15, 0, %v125_v33 }
  0xac   :  { %v131_v41 = vadd.s32 3, %v127_v38 }
  0xad   :  { %v268_v58 = vmin.u32 %v104_v55, %v102_v52  ;;  %v203_v59 = vadd.s32 536870912, %v202_v57 }
  0xae   :  { %v132_v46 = vand.u32 3, %v131_v41 }
  0xaf   :  { %v106_v60 = vclz %v268_v58  ;;  %v204_v61 = vshrl.u32 %v203_v59, 30 }
  0xb0   :  { %vm137_vm2 = vcmp.eq.s32.totalorder %v132_v46, 2  ;;  %vm134_vm3 = vcmp.eq.s32.totalorder %v132_v46, 0  ;;  %vm133_vm5 = vcmp.lt.s32.totalorder %v132_v46, 2 }
  0xb1   :  { %v269_v62 = vadd.s32 4294967294, %v106_v60  ;;  %v205_v63 = vshll.u32 %v204_v61, 30  ;;  %v228_v43 = vsub.s32 4, %v204_v61 }
  0xb3   :  { %vm270_vm12 = vcmp.lt.s32.totalorder %v269_v62, 0  ;;  %v206_v1 = vsub.s32 %v202_v57, %v205_v63  ;;  %v229_v47 = vsel %vm144_vm0, %v228_v43, %v204_v61 }
  0xb4   :  { %v109_v0 = vsel %vm270_vm12, 0, %v269_v62 }
  0xb5   :  { %v110_v5 = vsub.s32 32, %v109_v0  ;;  %v114_v6 = vsub.s32 4294967266, %v109_v0  ;;  %v208_v8 = vsub.s32 0, %v206_v1  ;;  %v111_v10 = vshll.u32 %v102_v52, %v109_v0 }
  0xb6   :  { %v231_v52 = vsel %vm420_vm1, 0, %v229_v47 }
  0xb7   :  { %v112_v11 = vshrl.u32 %v94_v2, %v110_v5  ;;  %v115_v12 = vadd.s32 127, %v114_v6  ;;  %v272_v13 = vmin.u32 %v208_v8, %v206_v1  ;;  %v235_v55 = vadd.s32 3, %v231_v52 }
  0xb9   :  { %v113_v15 = vor.u32 %v112_v11, %v111_v10  ;;  %v116_v16 = vshll.u32 %v115_v12, 23  ;;  %v210_v17 = vclz %v272_v13  ;;  %v236_v57 = vand.u32 3, %v235_v55 }
  0xbb   :  { %v117_v18 = vor.u32 4788187, %v116_v16  ;;  %v273_v19 = vadd.s32 4294967294, %v210_v17  ;;  %v120_v22 = vcvt.s32.f32 %v113_v15  ;;  %vm241_vm7 = vcmp.eq.s32.totalorder %v236_v57, 2 }
  0xbc   :  { %vm238_vm8 = vcmp.eq.s32.totalorder %v236_v57, 0  ;;  %vm237_vm9 = vcmp.lt.s32.totalorder %v236_v57, 2 }
  0xbd   :  { %v118_v21 = vand.u32 2147483647, %v117_v18  ;;  %vm274_vm13 = vcmp.lt.s32.totalorder %v273_v19, 0 }
  0xbe   :  { %v213_v26 = vsel %vm274_vm13, 0, %v273_v19 }
  0xbf   :  { %v121_v23 = vmul.f32 %v120_v22, %v118_v21  ;;  %v214_v4 = vsub.s32 32, %v213_v26  ;;  %v218_v28 = vsub.s32 4294967266, %v213_v26  ;;  %v215_v25 = vshll.u32 %v206_v1, %v213_v26 }
  0xc1   :  { %v122_v29 = vxor.u32 2147483648, %v121_v23  ;;  %v216_v30 = vshrl.u32 %v198_v3, %v214_v4  ;;  %v219_v31 = vadd.s32 127, %v218_v28 }
  0xc3   :  { %v123_v32 = vsel %vm40_vm14, %v122_v29, %v121_v23  ;;  %v217_v35 = vor.u32 %v216_v30, %v215_v25  ;;  %v220_v36 = vshll.u32 %v219_v31, 23 }
  0xc4   :  { %v126_v34 = vsel %vm39_vm15, %v363_v7, %v123_v32 }
  0xc5   :  { %294 = vcosq.f32 %v126_v34  ;;  %v221_v39 = vor.u32 4788187, %v220_v36  ;;  %v224_v40 = vcvt.s32.f32 %v217_v35 }
  0xc6   :  { %296 = vsinq.f32 %v126_v34 }
  0xc7   :  { %v222_v37 = vand.u32 2147483647, %v221_v39 }
  0xc9   :  { %v225_v42 = vmul.f32 %v224_v40, %v222_v37 }
  0xcb   :  { %v226_v44 = vxor.u32 2147483648, %v225_v42 }
  0xcd   :  { %v227_v45 = vsel %vm144_vm0, %v226_v44, %v225_v42 }
  0xce   :  { %v230_v49 = vsel %vm420_vm1, %v369_v14, %v227_v45 }
  0xcf   :  { %v295_v48 = vpop.eup %294  ;;  %298 = vcosq.f32 %v230_v49 }
  0xd0   :  { %v297_v50 = vpop.eup %296  ;;  %v138_v27 = vxor.u32 2147483648, %v295_v48  ;;  %300 = vsinq.f32 %v230_v49 }
  0xd1   :  { %v135_v51 = vxor.u32 2147483648, %v297_v50 }
  0xd2   :  { %v139_v20 = vsel %vm137_vm2, %v138_v27, %v297_v50 }
  0xd3   :  { %v136_v53 = vsel %vm134_vm3, %v295_v48, %v135_v51 }
  0xd4   :  { %v140_v54 = vsel %vm133_vm5, %v136_v53, %v139_v20 }
  0xd5   :  { %v141_v56 = vsel %vm130_vm6, nan, %v140_v54 }
  0xd6   :  { %247 = vst.msk [vmem:[#allocation2] sm:$0xff] %vm246_vm4, %v141_v56 }
  0xd9   :  { %v299_v58 = vpop.eup %298 }
  0xda   :  { %v301_v59 = vpop.eup %300  ;;  %v242_v60 = vxor.u32 2147483648, %v299_v58 }
  0xdb   :  { %v239_v61 = vxor.u32 2147483648, %v301_v59 }
  0xdc   :  { %v243_v62 = vsel %vm241_vm7, %v242_v60, %v301_v59 }
  0xdd   :  { %v240_v63 = vsel %vm238_vm8, %v299_v58, %v239_v61 }
  0xde   :  { %v244_v0 = vsel %vm237_vm9, %v240_v63, %v243_v62 }
  0xdf   :  { %v245_v1 = vsel %vm234_vm10, nan, %v244_v0 }
  0xe0   :  { %248 = vst.msk [vmem:[#allocation2 + $0x8] sm:$0xff] %vm246_vm4, %v245_v1 }
  0xe1   :  { %253 = vsyncadd [#allocation3], 128  ;;  %s333_s0 = smov [#allocation2]  }
  0xe2   :  { %s254_s1 = sshll.u32 %s333_s0, 4  ;;  %s255_s1 = int_to_ptr.vmem [resolvable:$true] %s254_s1 }
  0xe3   :  { %s302_s17 = scalar_lea.vmem %s255_s1, 128  ;;  %s306_s18 = scalar_lea.vmem %s255_s1, 256 }
  0xe4   :  { %p303_p0 = scmp.ne.s32.totalorder %s255_s1, %s302_s17  ;;  %p307_p1 = scmp.lt.s32.totalorder %s255_s1, %s255_s1 }
  0xe5   :  { %p308_p2 = scmp.lt.s32.totalorder %s306_s18, %s302_s17 }
  0xe7   :  { %p309_p3 = por %p308_p2, %p307_p1 }
  0xe9   :  { %p310_p4 = pnand %p309_p3, %p303_p0 }
  0xeb   :  { %313 = shalt.err (!%p310_p4)
}
  0xec   :  { %s314_s21 = scalar_lea.hbm %s447_s2, 128 }
  0xed   :  { %p315_p5 = scmp.ne.s32.totalorder %s447_s2, %s314_s21  ;;  %p318_p6 = scmp.lt.u32.totalorder %s314_s21, %s447_s2 }
  0xef   :  { %p320_p7 = pnand %p318_p6, %p315_p5 }
  0xf1   :  { %323 = shalt.err (!%p320_p7)
}
  0xf2   :  { %s334_s26 = smov 128   ;;  %s335_s27 = smov 8  }
  0xf3   :  { %260 = dma.vmem_to_hbm [thread:$0]  %s255_s1, 128, %s447_s2, [#allocation3], %s334_s26, %s334_s26, %s335_s27  }
  0xf4   :  { %324 = dma.done.wait [#allocation3], 256  }
  0xf5   :  { %325 = vsyncadd [#allocation3], 4294967040 }
  0xf6   :  { %264 = vsyncpa [#allocation3], 1 }

</bundles_post_ra>
